<compile_context>
chip_gen: v6e
topology: v6e:2x2x1
jax: 0.10.0
libtpu: 0.0.40
codegen_flags: <defaults>
</compile_context>

<pallas_src>
import functools

import jax
import jax.numpy as jnp
from jax import lax
from jax.experimental import pallas as pl
from jax.experimental.pallas import tpu as pltpu

_EPS = 1e-5          # PyTorch BatchNorm2d default
_NEG_SLOPE = 0.01    # PyTorch LeakyReLU default


def _downsample_kernel(p_ref, w_ref, g_ref, b_ref, o_ref, sum_ref, ssq_ref, *,
                       n_valid, tm, eps, neg_slope):
    # p_ref:   (CKK, TM)    im2col patches, transposed (positions on lanes), streamed
    # w_ref:   (BC, CKK)    flattened conv weight block (OIHW -> O, I*KH*KW), resident
    # g_ref, b_ref: (BC, 1) BatchNorm affine params, resident
    # o_ref:   (BC, R_pad)  output block, resident in VMEM across the R-tile axis
    # sum_ref, ssq_ref: (BC, 1) f32 scratch -- streamed BN statistics
    r = pl.program_id(1)

    @pl.when(r == 0)
    def _init():
        sum_ref[...] = jnp.zeros_like(sum_ref)
        ssq_ref[...] = jnp.zeros_like(ssq_ref)

    # Conv as a lane-dense GEMM tile: (BC, CKK) @ (CKK, TM) -> (BC, TM), f32 accumulation.
    tile = jnp.dot(w_ref[...], p_ref[...], preferred_element_type=jnp.float32)
    off = pl.multiple_of(r * tm, tm)
    o_ref[:, pl.ds(off, tm)] = tile

    # Streamed BN statistics; padded patch columns are exactly zero -> contribute nothing.
    sum_ref[...] += jnp.sum(tile, axis=1, keepdims=True)
    ssq_ref[...] += jnp.sum(tile * tile, axis=1, keepdims=True)

    # Last R-tile: single normalize + affine + LeakyReLU pass over the resident output.
    @pl.when(r == pl.num_programs(1) - 1)
    def _finalize():
        inv_n = 1.0 / float(n_valid)
        mean = sum_ref[...] * inv_n
        # Biased variance (PyTorch training-mode BN); clamp guards tiny f32 cancellation.
        var = jnp.maximum(ssq_ref[...] * inv_n - mean * mean, 0.0)
        scale = g_ref[...] * lax.rsqrt(var + eps)
        shift = b_ref[...] - mean * scale
        z = o_ref[...] * scale + shift
        o_ref[...] = jnp.where(z >= 0, z, neg_slope * z)


def _round_up(x, m):
    return ((x + m - 1) // m) * m


def _pick_tm(r_total):
    # ~8 grid steps, multiple of 128, clamped to [128, 1024].
    tm = _round_up(max(pl.cdiv(r_total, 8), 128), 128)
    return min(tm, 1024)


def _pick_bc(c):
    # Channel block: full C when small; otherwise a multiple of 8 dividing C so the
    # parallel channel axis has >1 step (v7x megacore) and the resident output stays small.
    if c <= 64:
        return c
    for bc in (128, 64, 32, 16, 8):
        if c % bc == 0:
            return bc
    return c


@functools.partial(jax.jit, static_argnames=("gemm_dtype",))
def downsample_forward(x, w, gamma, beta, gemm_dtype=jnp.bfloat16):
    """x: (N, C, H, W) f32; w: (C, C, 3, 3) OIHW; gamma/beta: (C,).  Returns NCHW f32."""
    N, C, H, W = x.shape
    K, S, P = 3, 2, 1
    OH = (H + 2 * P - K) // S + 1
    OW = (W + 2 * P - K) // S + 1
    R = N * OH * OW
    CKK = C * K * K

    TM = _pick_tm(R)
    R_pad = _round_up(R, TM)
    BC = _pick_bc(C)

    # Reflect padding (padding_mode='reflect'); im2col built directly in the transposed
    # (CKK, R) layout: feature order (ci, kh, kw) matches w.reshape(C, C*K*K), position
    # order (n, oh, ow) matches the output reshape.
    # TODO(synk): move pad+im2col into the kernel -- this is the dominant HBM cost.
    xp = jnp.pad(x, ((0, 0), (0, 0), (P, P), (P, P)), mode="reflect").astype(gemm_dtype)
    taps = [xp[:, :, kh:kh + OH * S:S, kw:kw + OW * S:S]           # each (N, C, OH, OW)
            for kh in range(K) for kw in range(K)]
    pat = jnp.stack(taps, axis=2)                                  # (N, C, 9, OH, OW)
    patches_t = pat.transpose(1, 2, 0, 3, 4).reshape(CKK, R)       # (CKK, R)
    if R_pad != R:
        patches_t = jnp.pad(patches_t, ((0, 0), (0, R_pad - R)))   # zeros: BN-neutral

    w2 = w.reshape(C, CKK).astype(gemm_dtype)
    g2 = gamma.reshape(C, 1).astype(jnp.float32)
    b2 = beta.reshape(C, 1).astype(jnp.float32)

    # Explicit scoped-VMEM budget: resident output + double-buffered patch tiles + weights.
    isz = jnp.dtype(gemm_dtype).itemsize
    vmem_needed = (BC * R_pad * 4          # resident f32 output block
                   + 2 * CKK * TM * isz    # double-buffered patch tiles
                   + 2 * BC * CKK * isz    # conv-weight block
                   + BC * TM * 4           # matmul tile temporary
                   + 8 * BC * 4)           # gamma/beta/sum/sumsq
    vmem_limit = int(min(100 * (2 ** 20), max(vmem_needed + (8 << 20), 32 << 20)))

    out_t = pl.pallas_call(
        functools.partial(_downsample_kernel, n_valid=R, tm=TM,
                          eps=_EPS, neg_slope=_NEG_SLOPE),
        out_shape=jax.ShapeDtypeStruct((C, R_pad), jnp.float32),
        grid_spec=pltpu.PrefetchScalarGridSpec(
            num_scalar_prefetch=0,
            grid=(C // BC, R_pad // TM),
            in_specs=[
                pl.BlockSpec((CKK, TM), lambda cb, r: (0, r)),    # patches (streamed)
                pl.BlockSpec((BC, CKK), lambda cb, r: (cb, 0)),   # conv weight (resident)
                pl.BlockSpec((BC, 1), lambda cb, r: (cb, 0)),     # BN gamma (resident)
                pl.BlockSpec((BC, 1), lambda cb, r: (cb, 0)),     # BN beta  (resident)
            ],
            out_specs=pl.BlockSpec((BC, R_pad), lambda cb, r: (cb, 0)),  # resident output
            scratch_shapes=[pltpu.VMEM((BC, 1), jnp.float32),     # streamed BN sum
                            pltpu.VMEM((BC, 1), jnp.float32)],    # streamed BN sum-of-sq
        ),
        compiler_params=pltpu.CompilerParams(
            dimension_semantics=("parallel", "arbitrary"),
            vmem_limit_bytes=vmem_limit,
        ),
    )(patches_t, w2, g2, b2)

    # TODO(synk): fold this transpose into an n-aware output index_map.
    out = out_t[:, :R].reshape(C, N, OH, OW).transpose(1, 0, 2, 3)   # NCHW
    return out


def _downsample_ref(x, w, gamma, beta, eps=_EPS, neg_slope=_NEG_SLOPE):
    """Pure-JAX f32 reference matching the PyTorch module in training mode."""
    xp = jnp.pad(x, ((0, 0), (0, 0), (1, 1), (1, 1)), mode="reflect")
    y = lax.conv_general_dilated(
        xp, w, window_strides=(2, 2), padding="VALID",
        dimension_numbers=("NCHW", "OIHW", "NCHW"),
        precision=lax.Precision.HIGHEST)
    mean = y.mean(axis=(0, 2, 3), keepdims=True)
    var = y.var(axis=(0, 2, 3), keepdims=True)      # biased, as in PyTorch training BN
    yn = (y - mean) * lax.rsqrt(var + eps)
    z = yn * gamma.reshape(1, -1, 1, 1) + beta.reshape(1, -1, 1, 1)
    return jnp.where(z >= 0, z, neg_slope * z)


if __name__ == "__main__":
    channel, N, H, W = 4, 2, 16, 16

    key = jax.random.PRNGKey(0)
    kx, kw = jax.random.split(key)

    # Conv2d(channel, channel, 3, bias=False) PyTorch-style uniform init
    fan_in = channel * 3 * 3
    bound = 1.0 / (fan_in ** 0.5)
    w = jax.random.uniform(kw, (channel, channel, 3, 3), jnp.float32, -bound, bound)
    # Fresh BatchNorm2d parameters
    gamma = jnp.ones((channel,), jnp.float32)
    beta = jnp.zeros((channel,), jnp.float32)

    x = jax.random.normal(kx, (N, channel, H, W), jnp.float32)

    ref = _downsample_ref(x, w, gamma, beta)

    # Exact f32 GEMM path.
    out_f32 = downsample_forward(x, w, gamma, beta, gemm_dtype=jnp.float32)
    jax.block_until_ready(out_f32)
    assert out_f32.shape == (N, channel, H // 2, W // 2), out_f32.shape
    assert jnp.allclose(out_f32, ref, atol=1e-4, rtol=1e-4), \
        float(jnp.abs(out_f32 - ref).max())

    # Default bf16-operand path (f32 accumulation): looser tolerance for input rounding.
    out_bf16 = downsample_forward(x, w, gamma, beta)
    jax.block_until_ready(out_bf16)
    assert out_bf16.shape == (N, channel, H // 2, W // 2), out_bf16.shape
    assert jnp.allclose(out_bf16, ref, atol=3e-2, rtol=3e-2), \
        float(jnp.abs(out_bf16 - ref).max())

    print("KERNEL_OK")
</pallas_src>

<mosaic_0001>
module attributes {stable_mosaic.version = 11 : i64} {
  func.func @_downsample_kernel(%arg0: i32, %arg1: i32, %arg2: memref<36x128xf32, #tpu.memory_space<vmem>>, %arg3: memref<4x36xf32, #tpu.memory_space<vmem>>, %arg4: memref<4x1xf32, #tpu.memory_space<vmem>>, %arg5: memref<4x1xf32, #tpu.memory_space<vmem>>, %arg6: memref<4x128xf32, #tpu.memory_space<vmem>>, %arg7: memref<4x1xf32, #tpu.memory_space<vmem>>, %arg8: memref<4x1xf32, #tpu.memory_space<vmem>>) attributes {dimension_semantics = [#tpu.dimension_semantics<parallel>, #tpu.dimension_semantics<arbitrary>], iteration_bounds = array<i64: 1, 1>, scalar_prefetch = 0 : i64, scratch_operands = 2 : i64, tpu.core_type = #tpu.core_type<tc>, window_params = [{transform_indices = @transform_0, window_bounds = array<i64: 36, 128>}, {transform_indices = @transform_1, window_bounds = array<i64: 4, 36>}, {transform_indices = @transform_2, window_bounds = array<i64: 4, 1>}, {transform_indices = @transform_3, window_bounds = array<i64: 4, 1>}, {transform_indices = @transform_4, window_bounds = array<i64: 4, 128>}]} {
    %c0_i32 = arith.constant 0 : i32
    %0 = arith.cmpi eq, %arg1, %c0_i32 : i32
    %1 = arith.extui %0 : i1 to i32
    %c0_i32_0 = arith.constant 0 : i32
    %2 = arith.cmpi ne, %1, %c0_i32_0 : i32
    scf.if %2 {
      %cst_17 = arith.constant 0.000000e+00 : f32
      %24 = vector.broadcast %cst_17 : f32 to vector<4x1xf32>
      %c0_18 = arith.constant 0 : index
      %c0_19 = arith.constant 0 : index
      %25 = vector.load %arg7[%c0_18, %c0_19] : memref<4x1xf32, #tpu.memory_space<vmem>>, vector<4x1xf32>
      tpu.vector_store %arg7[%c0_18, %c0_19], %24 {strides = array<i32>} : memref<4x1xf32, #tpu.memory_space<vmem>>, vector<4x1xf32>,
      %cst_20 = arith.constant 0.000000e+00 : f32
      %26 = vector.broadcast %cst_20 : f32 to vector<4x1xf32>
      %c0_21 = arith.constant 0 : index
      %c0_22 = arith.constant 0 : index
      %27 = vector.load %arg8[%c0_21, %c0_22] : memref<4x1xf32, #tpu.memory_space<vmem>>, vector<4x1xf32>
      tpu.vector_store %arg8[%c0_21, %c0_22], %26 {strides = array<i32>} : memref<4x1xf32, #tpu.memory_space<vmem>>, vector<4x1xf32>,
    } else {
    }
    %c0 = arith.constant 0 : index
    %c0_1 = arith.constant 0 : index
    %3 = vector.load %arg3[%c0, %c0_1] : memref<4x36xf32, #tpu.memory_space<vmem>>, vector<4x36xf32>
    %c0_2 = arith.constant 0 : index
    %c0_3 = arith.constant 0 : index
    %4 = vector.load %arg2[%c0_2, %c0_3] : memref<36x128xf32, #tpu.memory_space<vmem>>, vector<36x128xf32>
    %cst = arith.constant dense<0.000000e+00> : vector<4x128xf32>
    %5 = tpu.matmul %3, %4, %cst {dimension_numbers = #tpu.dot_dimension_numbers<[1], [0], [0], [1], [0, 0, 1, 1], [], []>} : vector<4x36xf32>, vector<36x128xf32>, vector<4x128xf32> -> vector<4x128xf32>
    %c128_i32 = arith.constant 128 : i32
    %6 = arith.muli %arg1, %c128_i32 : i32
    %7 = tpu.assume_multiple %6, 128 : i32
    %c0_4 = arith.constant 0 : index
    %8 = arith.index_cast %7 : i32 to index
    %9 = vector.load %arg6[%c0_4, %8] : memref<4x128xf32, #tpu.memory_space<vmem>>, vector<4x128xf32>
    tpu.vector_store %arg6[%c0_4, %8], %5 {strides = array<i32>} : memref<4x128xf32, #tpu.memory_space<vmem>>, vector<4x128xf32>,
    %c0_5 = arith.constant 0 : index
    %c0_6 = arith.constant 0 : index
    %10 = vector.load %arg7[%c0_5, %c0_6] : memref<4x1xf32, #tpu.memory_space<vmem>>, vector<4x1xf32>
    %cst_7 = arith.constant dense<0.000000e+00> : vector<4xf32>
    %11 = vector.multi_reduction <add>, %5, %cst_7 [1] : vector<4x128xf32> to vector<4xf32>
    %12 = vector.shape_cast %11 : vector<4xf32> to vector<4x1xf32>
    %13 = arith.addf %10, %12 : vector<4x1xf32>
    %c0_8 = arith.constant 0 : index
    %c0_9 = arith.constant 0 : index
    %14 = vector.load %arg7[%c0_8, %c0_9] : memref<4x1xf32, #tpu.memory_space<vmem>>, vector<4x1xf32>
    tpu.vector_store %arg7[%c0_8, %c0_9], %13 {strides = array<i32>} : memref<4x1xf32, #tpu.memory_space<vmem>>, vector<4x1xf32>,
    %c0_10 = arith.constant 0 : index
    %c0_11 = arith.constant 0 : index
    %15 = vector.load %arg8[%c0_10, %c0_11] : memref<4x1xf32, #tpu.memory_space<vmem>>, vector<4x1xf32>
    %16 = arith.mulf %5, %5 : vector<4x128xf32>
    %cst_12 = arith.constant dense<0.000000e+00> : vector<4xf32>
    %17 = vector.multi_reduction <add>, %16, %cst_12 [1] : vector<4x128xf32> to vector<4xf32>
    %18 = vector.shape_cast %17 : vector<4xf32> to vector<4x1xf32>
    %19 = arith.addf %15, %18 : vector<4x1xf32>
    %c0_13 = arith.constant 0 : index
    %c0_14 = arith.constant 0 : index
    %20 = vector.load %arg8[%c0_13, %c0_14] : memref<4x1xf32, #tpu.memory_space<vmem>>, vector<4x1xf32>
    tpu.vector_store %arg8[%c0_13, %c0_14], %19 {strides = array<i32>} : memref<4x1xf32, #tpu.memory_space<vmem>>, vector<4x1xf32>,
    %c0_i32_15 = arith.constant 0 : i32
    %21 = arith.cmpi eq, %arg1, %c0_i32_15 : i32
    %22 = arith.extui %21 : i1 to i32
    %c0_i32_16 = arith.constant 0 : i32
    %23 = arith.cmpi ne, %22, %c0_i32_16 : i32
    scf.if %23 {
      %c0_17 = arith.constant 0 : index
      %c0_18 = arith.constant 0 : index
      %24 = vector.load %arg7[%c0_17, %c0_18] : memref<4x1xf32, #tpu.memory_space<vmem>>, vector<4x1xf32>
      %cst_19 = arith.constant 7.812500e-03 : f32
      %25 = vector.broadcast %cst_19 : f32 to vector<4x1xf32>
      %26 = arith.mulf %24, %25 : vector<4x1xf32>
      %c0_20 = arith.constant 0 : index
      %c0_21 = arith.constant 0 : index
      %27 = vector.load %arg8[%c0_20, %c0_21] : memref<4x1xf32, #tpu.memory_space<vmem>>, vector<4x1xf32>
      %cst_22 = arith.constant 7.812500e-03 : f32
      %28 = vector.broadcast %cst_22 : f32 to vector<4x1xf32>
      %29 = arith.mulf %27, %28 : vector<4x1xf32>
      %30 = arith.mulf %26, %26 : vector<4x1xf32>
      %31 = arith.subf %29, %30 : vector<4x1xf32>
      %cst_23 = arith.constant 0.000000e+00 : f32
      %32 = vector.broadcast %cst_23 : f32 to vector<4x1xf32>
      %33 = arith.maximumf %31, %32 : vector<4x1xf32>
      %c0_24 = arith.constant 0 : index
      %c0_25 = arith.constant 0 : index
      %34 = vector.load %arg4[%c0_24, %c0_25] : memref<4x1xf32, #tpu.memory_space<vmem>>, vector<4x1xf32>
      %cst_26 = arith.constant 9.99999974E-6 : f32
      %35 = vector.broadcast %cst_26 : f32 to vector<4x1xf32>
      %36 = arith.addf %33, %35 : vector<4x1xf32>
      %37 = math.rsqrt %36 : vector<4x1xf32>
      %38 = arith.mulf %34, %37 : vector<4x1xf32>
      %c0_27 = arith.constant 0 : index
      %c0_28 = arith.constant 0 : index
      %39 = vector.load %arg5[%c0_27, %c0_28] : memref<4x1xf32, #tpu.memory_space<vmem>>, vector<4x1xf32>
      %40 = arith.mulf %26, %38 : vector<4x1xf32>
      %41 = arith.subf %39, %40 : vector<4x1xf32>
      %c0_29 = arith.constant 0 : index
      %c0_30 = arith.constant 0 : index
      %42 = vector.load %arg6[%c0_29, %c0_30] : memref<4x128xf32, #tpu.memory_space<vmem>>, vector<4x128xf32>
      %43 = vector.broadcast %38 : vector<4x1xf32> to vector<4x128xf32>
      %44 = arith.mulf %42, %43 : vector<4x128xf32>
      %45 = vector.broadcast %41 : vector<4x1xf32> to vector<4x128xf32>
      %46 = arith.addf %44, %45 : vector<4x128xf32>
      %cst_31 = arith.constant 0.000000e+00 : f32
      %47 = vector.broadcast %cst_31 : f32 to vector<4x128xf32>
      %48 = arith.cmpf oge, %46, %47 : vector<4x128xf32>
      %cst_32 = arith.constant 0.00999999977 : f32
      %49 = vector.broadcast %cst_32 : f32 to vector<4x128xf32>
      %50 = arith.mulf %49, %46 : vector<4x128xf32>
      %51 = arith.select %48, %46, %50 : vector<4x128xi1>, vector<4x128xf32>
      %c0_33 = arith.constant 0 : index
      %c0_34 = arith.constant 0 : index
      %52 = vector.load %arg6[%c0_33, %c0_34] : memref<4x128xf32, #tpu.memory_space<vmem>>, vector<4x128xf32>
      tpu.vector_store %arg6[%c0_33, %c0_34], %51 {strides = array<i32>} : memref<4x128xf32, #tpu.memory_space<vmem>>, vector<4x128xf32>,
    } else {
    }
    return
  }
  func.func @transform_0(%arg0: i32, %arg1: i32) -> (i32, i32) {
    %c0_i32 = arith.constant 0 : i32
    %c0_i32_0 = arith.constant 0 : i32
    return %c0_i32, %arg1 : i32, i32
  }
  func.func @transform_1(%arg0: i32, %arg1: i32) -> (i32, i32) {
    %c0_i32 = arith.constant 0 : i32
    %c0_i32_0 = arith.constant 0 : i32
    return %arg0, %c0_i32 : i32, i32
  }
  func.func @transform_2(%arg0: i32, %arg1: i32) -> (i32, i32) {
    %c0_i32 = arith.constant 0 : i32
    %c0_i32_0 = arith.constant 0 : i32
    return %arg0, %c0_i32 : i32, i32
  }
  func.func @transform_3(%arg0: i32, %arg1: i32) -> (i32, i32) {
    %c0_i32 = arith.constant 0 : i32
    %c0_i32_0 = arith.constant 0 : i32
    return %arg0, %c0_i32 : i32, i32
  }
  func.func @transform_4(%arg0: i32, %arg1: i32) -> (i32, i32) {
    %c0_i32 = arith.constant 0 : i32
    %c0_i32_0 = arith.constant 0 : i32
    return %arg0, %c0_i32 : i32, i32
  }
}

</mosaic_0001>

<bundles_post_ra>
// kernel: downsample_forward.1
= control target key start
LH: loop header
LB: loop body
LE: loop exit
PB: predicated region body
PF: predicated region fallthrough
CT: control target
= control target key end

     0   :  { %vm34_vm0 = vcmask 1043456   ;;  %v194_v0 = vmov 0.0   ;;  %vm195_vm1 = vmmov 0   ;;  %vm30_vm2 = vcmask 293888   ;;  %s262_s0 = inlined_call_operand.vmem [shape: f32[36,128], index: 0, kind: input, shape index: {}]   ;;  %s263_s1 = inlined_call_operand.vmem [shape: f32[4,36], index: 1, kind: input, shape index: {}]   ;;  %s264_s4 = inlined_call_operand.vmem [shape: f32[4,128], index: 4, kind: output, shape index: {}]   ;;  %s265_s2 = inlined_call_operand.vmem [shape: f32[4,1], index: 2, kind: input, shape index: {}]   ;;  %s266_s3 = inlined_call_operand.vmem [shape: f32[4,1], index: 3, kind: input, shape index: {}]  }
   0x1   :  { %174 = vmatprep.subr.mxu0 %v194_v0  ;;  %v29_v1 = vld [vmem:[%s262_s0 + $0x20] sm:$0xf]  ;;  %v28_v2 = vld [vmem:[%s262_s0 + $0x18] sm:$0xff]  ;;  %184 = vmatprep.mubr.msk.f32.mxu0 %vm195_vm1, %v194_v0  ;;  %v27_v3 = vld [vmem:[%s262_s0 + $0x10] sm:$0xff]  ;;  %vm21_vm3 = vcmask 3072   ;;  %v196_v12 = vmov 0  }
   0x2   :  { %175 = vmatpush3.msk.msra.mxu0 %vm34_vm0, %v29_v1  ;;  %v26_v4 = vld [vmem:[%s262_s0 + $0x8] sm:$0xff]  ;;  %v25_v5 = vld [vmem:[%s262_s0] sm:$0xff]  ;;  %22 = vst.msk [vmem:[#allocation2] sm:$0xf] %vm21_vm3, %v194_v0  ;;  %23 = vst.msk [vmem:[#allocation3] sm:$0xf] %vm21_vm3, %v194_v0  ;;  %190 = vset.pattern.permute.xlu1 %v196_v12 }
   0x3   :  { %176 = vmatprep.subr.mxu0 %v194_v0  ;;  %v24_v6 = vld [vmem:[%s263_s1] sm:$0xf]  ;;  %191 = vset.pattern.permute.xlu0 %v196_v12 }
   0x4   :  { %177 = vmatpush3.msra.mxu0 %v28_v2  ;;  %v137_v27 = vld [vmem:[%s265_s2] sm:$0xf] }
   0x5   :  { %178 = vmatprep.subr.mxu0 %v194_v0  ;;  %v141_v30 = vld [vmem:[%s266_s3] sm:$0xf] }
   0x6   :  { %179 = vmatpush3.msra.mxu0 %v27_v3 }
   0x7   :  { %180 = vmatprep.subr.mxu0 %v194_v0 }
   0x8   :  { %181 = vmatpush3.msra.mxu0 %v26_v4 }
   0x9   :  { %182 = vmatprep.subr.mxu0 %v194_v0  ;;  %v113_v13 = vld [vmem:[#allocation2] sm:$0xf]  ;;  %v120_v16 = vld [vmem:[#allocation3] sm:$0xf] }
   0xa   :  { %183 = vmatpush3.msra.mxu0 %v25_v5 }
   0xb   :  { %185 = vmatmul.mubr.msk.f32.vlgmr.msra.gmra.mxu0 %vm30_vm2, %v24_v6 }
  0xcb   :  { %v104_v7 = vpop.f32.mrf.mxu0 }
  0xcc   :  { %112 = vst [vmem:[%s264_s4] sm:$0xf] %v104_v7  ;;  %v114_v8 = vsel %vm34_vm0, %v104_v7, 0.0  ;;  %v121_v9 = vmul.f32 %v104_v7, %v104_v7 }
  0xcd   :  { %115 = vadd.xlane.f32.xlu0 %v114_v8  ;;  %v186_v10 = vpop.f32.mrf.mxu0 }
  0xce   :  { %v122_v11 = vsel %vm34_vm0, %v121_v9, 0.0 }
  0xd1   :  { %123 = vadd.xlane.f32.xlu0 %v122_v11 }
  0xd3   :  { %v144_v34 = vld [vmem:[%s264_s4] sm:$0xf] }
 0x156   :  { %v116_v14 = vpop.xlane.xlu0 %115 }
 0x157   :  { %v117_v15 = vadd.f32 %v116_v14, %v113_v13 }
 0x159   :  { %119 = vst.msk [vmem:[#allocation2] sm:$0xf] %vm21_vm3, %v117_v15 }
 0x15a   :  { %v124_v17 = vpop.xlane.xlu0 %123 }
 0x15b   :  { %v125_v18 = vadd.f32 %v124_v17, %v120_v16 }
 0x15d   :  { %126 = vst.msk [vmem:[#allocation3] sm:$0xf] %vm21_vm3, %v125_v18 }
 0x160   :  { %v130_v19 = vld [vmem:[#allocation2] sm:$0xf] }
 0x161   :  { %v131_v20 = vmul.f32 0.0078125, %v130_v19 }
 0x163   :  { %v134_v23 = vmul.f32 %v131_v20, %v131_v20 }
 0x164   :  { %v132_v21 = vld [vmem:[#allocation3] sm:$0xf] }
 0x165   :  { %v133_v22 = vmul.f32 0.0078125, %v132_v21 }
 0x167   :  { %v135_v24 = vsub.f32 %v133_v22, %v134_v23 }
 0x169   :  { %v136_v25 = vmax.f32 %v135_v24, 0.0 }
 0x16b   :  { %v138_v26 = vadd.f32 1e-05, %v136_v25 }
 0x16d   :  { %192 = vrsqrt.f32 %v138_v26 }
 0x17a   :  { %v193_v28 = vpop.eup %192 }
 0x17b   :  { %v140_v29 = vmul.f32 %v193_v28, %v137_v27 }
 0x17d   :  { %147 = vperm.xlu1 %190, %v140_v29   ;;  %v142_v31 = vmul.f32 %v140_v29, %v131_v20 }
 0x17f   :  { %v143_v32 = vsub.f32 %v141_v30, %v142_v31 }
 0x181   :  { %153 = vperm.xlu1 %190, %v143_v32  }
 0x1f8   :  { %v148_v33 = vpop.permute.xlu1 %147 }
 0x1f9   :  { %v150_v35 = vmul.f32 %v148_v33, %v144_v34 }
 0x1fc   :  { %v154_v36 = vpop.permute.xlu1 %153 }
 0x1fd   :  { %v156_v37 = vadd.f32 %v154_v36, %v150_v35 }
 0x1ff   :  { %vm157_vm4 = vcmp.ge.f32.partialorder %v156_v37, 0.0  ;;  %v158_v38 = vmul.f32 0.01, %v156_v37 }
 0x201   :  { %v159_v39 = vsel %vm157_vm4, %v156_v37, %v158_v38 }
 0x202   :  { %160 = vst [vmem:[%s264_s4] sm:$0xf] %v159_v39 }

</bundles_post_ra>
